<compile_context>
chip_gen: v7x
topology: tpu7x:2x2x1
jax: 0.10.0
libtpu: 0.0.40
codegen_flags: <defaults>
</compile_context>

<pallas_src>
import functools

import jax
import jax.numpy as jnp
from jax import lax
from jax.experimental import pallas as pl
from jax.experimental.pallas import tpu as pltpu


def _scalenorm_kernel(scale_ref, x_ref, o_ref, *, eps):
    # scale_ref: (1,) f32 in SMEM; x_ref / o_ref: (block_rows, hidden) in VMEM.
    x = x_ref[...]
    x32 = x.astype(jnp.float32)
    # Per-row squared L2 norm along the last (lane) axis, accumulated in f32.
    sq_sum = jnp.sum(x32 * x32, axis=-1, keepdims=True)
    # scale / clamp(sqrt(sq_sum), eps) == scale * rsqrt(max(sq_sum, eps^2))
    # (sqrt is monotone, eps > 0): one EUP op on a (block_rows, 1) vector.
    inv = lax.rsqrt(jnp.maximum(sq_sum, eps * eps))
    factor = scale_ref[0] * inv  # (block_rows, 1) f32
    if x.dtype == jnp.float32:
        o_ref[...] = x32 * factor
    else:
        # bf16/f16: multiply the native-dtype tile by the tiny cast factor so
        # no full f32 copy of the tile is kept live (v6e/v7x bf16 VPU).
        o_ref[...] = x * factor.astype(x.dtype)


def _sublane_multiple(dtype) -> int:
    # Sublane packing: f32 -> 8, bf16/f16 -> 16, int8/fp8 -> 32.
    itemsize = jnp.dtype(dtype).itemsize
    if itemsize >= 4:
        return 8
    if itemsize == 2:
        return 16
    return 32


def _choose_block_rows(rows, hidden, dtype, *,
                       vmem_budget_bytes=12 * 1024 * 1024,
                       min_grid_steps=8,
                       max_block_rows=2048):
    """Row tile: fits a small VMEM budget AND keeps >= min_grid_steps steps."""
    sublane = _sublane_multiple(dtype)
    itemsize = jnp.dtype(dtype).itemsize
    # Per block row: input + output tile, each double-buffered by the
    # pipeline, plus an f32 allowance for reduction intermediates.
    per_row = 2 * 2 * hidden * itemsize + hidden * 4
    br_budget = max(sublane, (vmem_budget_bytes // per_row) // sublane * sublane)
    # Never collapse to a 1-step grid: target >= min_grid_steps steps so the
    # DMA double-buffer overlaps and v7x's two TensorCores both get rows.
    rows_per_step = -(-rows // min_grid_steps)            # ceil div
    br_grid = max(sublane, -(-rows_per_step // sublane) * sublane)
    return max(sublane, min(br_budget, br_grid, max_block_rows))


def scale_norm(x, scale, eps=1e-5, block_rows=None):
    """ScaleNorm forward. x: (..., hidden); scale: scalar parameter."""
    orig_shape = x.shape
    hidden = orig_shape[-1]
    rows = 1
    for d in orig_shape[:-1]:
        rows *= d
    x2 = x.reshape(rows, hidden)

    # Pad hidden up to a lane multiple (128) for unmasked lane-dense vector
    # loads/stores. Zero padding is exact for the sum-of-squares; sliced back.
    hidden_p = -(-hidden // 128) * 128
    if hidden_p != hidden:
        x2 = jnp.pad(x2, ((0, 0), (0, hidden_p - hidden)))

    if block_rows is None:
        block_rows = _choose_block_rows(rows, hidden_p, x.dtype)

    grid = (pl.cdiv(rows, block_rows),)

    scale_arr = jnp.asarray(scale, dtype=jnp.float32).reshape(1)
    kernel = functools.partial(_scalenorm_kernel, eps=float(eps))

    out = pl.pallas_call(
        kernel,
        out_shape=jax.ShapeDtypeStruct((rows, hidden_p), x.dtype),
        grid=grid,
        in_specs=[
            pl.BlockSpec(memory_space=pltpu.SMEM),                 # scale
            pl.BlockSpec((block_rows, hidden_p), lambda i: (i, 0)),
        ],
        out_specs=pl.BlockSpec((block_rows, hidden_p), lambda i: (i, 0)),
        compiler_params=pltpu.CompilerParams(
            dimension_semantics=("parallel",),
            vmem_limit_bytes=32 * 1024 * 1024,
        ),
    )(scale_arr, x2)

    if hidden_p != hidden:
        out = out[:, :hidden]
    return out.reshape(orig_shape)


def scale_norm_ref(x, scale, eps=1e-5):
    """Pure-JAX reference mirroring the PyTorch forward."""
    norm = jnp.linalg.norm(x.astype(jnp.float32), axis=-1, keepdims=True)
    norm = jnp.maximum(norm, eps)
    return (x.astype(jnp.float32) * (scale / norm)).astype(x.dtype)


if __name__ == "__main__":
    key = jax.random.PRNGKey(0)
    batch, seq, hidden = 2, 8, 32
    x = jax.random.normal(key, (batch, seq, hidden), dtype=jnp.float32)

    # ScaleNorm is typically built with scale = sqrt(hidden); eps = 1e-5.
    scale = jnp.sqrt(jnp.float32(hidden))
    eps = 1e-5

    out = jax.block_until_ready(scale_norm(x, scale, eps=eps))
    ref = scale_norm_ref(x, scale, eps=eps)
    assert out.shape == x.shape and out.dtype == x.dtype
    assert jnp.allclose(out, ref, atol=1e-5, rtol=1e-5), "mismatch vs reference"

    # Edge case: rows not a multiple of block_rows (edge-block writes masked).
    x2 = jax.random.normal(jax.random.PRNGKey(1), (3, 5, hidden),
                           dtype=jnp.float32)
    out2 = jax.block_until_ready(scale_norm(x2, scale, eps=eps))
    ref2 = scale_norm_ref(x2, scale, eps=eps)
    assert jnp.allclose(out2, ref2, atol=1e-5, rtol=1e-5), "edge-block mismatch"

    print("KERNEL_OK")
</pallas_src>

<mosaic_0001>
module attributes {stable_mosaic.version = 11 : i64} {
  func.func @_scalenorm_kernel(%arg0: i32, %arg1: memref<1xf32, #tpu.memory_space<smem>>, %arg2: memref<8x128xf32, #tpu.memory_space<vmem>>, %arg3: memref<8x128xf32, #tpu.memory_space<vmem>>) attributes {dimension_semantics = [#tpu.dimension_semantics<parallel>], iteration_bounds = array<i64: 2>, scalar_prefetch = 0 : i64, scratch_operands = 0 : i64, tpu.core_type = #tpu.core_type<tc>, window_params = [{transform_indices = @transform_0, window_bounds = array<i64: 1>}, {transform_indices = @transform_1, window_bounds = array<i64: 8, 128>}, {transform_indices = @transform_2, window_bounds = array<i64: 8, 128>}]} {
    %c0 = arith.constant 0 : index
    %c0_0 = arith.constant 0 : index
    %0 = vector.load %arg2[%c0, %c0_0] : memref<8x128xf32, #tpu.memory_space<vmem>>, vector<8x128xf32>
    %1 = arith.mulf %0, %0 : vector<8x128xf32>
    %cst = arith.constant dense<0.000000e+00> : vector<8xf32>
    %2 = vector.multi_reduction <add>, %1, %cst [1] : vector<8x128xf32> to vector<8xf32>
    %3 = vector.shape_cast %2 : vector<8xf32> to vector<8x1xf32>
    %cst_1 = arith.constant 1.000000e-10 : f32
    %4 = vector.broadcast %cst_1 : f32 to vector<8x1xf32>
    %5 = arith.maximumf %3, %4 : vector<8x1xf32>
    %6 = math.rsqrt %5 : vector<8x1xf32>
    %c0_2 = arith.constant 0 : index
    %7 = memref.load %arg1[%c0_2] : memref<1xf32, #tpu.memory_space<smem>>
    %8 = vector.broadcast %7 : f32 to vector<8x1xf32>
    %9 = arith.mulf %8, %6 : vector<8x1xf32>
    %10 = vector.broadcast %9 : vector<8x1xf32> to vector<8x128xf32>
    %11 = arith.mulf %0, %10 : vector<8x128xf32>
    %c0_3 = arith.constant 0 : index
    %c0_4 = arith.constant 0 : index
    %12 = vector.load %arg3[%c0_3, %c0_4] : memref<8x128xf32, #tpu.memory_space<vmem>>, vector<8x128xf32>
    tpu.vector_store %arg3[%c0_3, %c0_4], %11 {strides = array<i32>} : memref<8x128xf32, #tpu.memory_space<vmem>>, vector<8x128xf32>,
    return
  }
  func.func @transform_0(%arg0: i32) -> i32 {
    %c0_i32 = arith.constant 0 : i32
    %c0_i32_0 = arith.constant 0 : i32
    return %c0_i32 : i32
  }
  func.func @transform_1(%arg0: i32) -> (i32, i32) {
    %c0_i32 = arith.constant 0 : i32
    %c0_i32_0 = arith.constant 0 : i32
    return %arg0, %c0_i32 : i32, i32
  }
  func.func @transform_2(%arg0: i32) -> (i32, i32) {
    %c0_i32 = arith.constant 0 : i32
    %c0_i32_0 = arith.constant 0 : i32
    return %arg0, %c0_i32 : i32, i32
  }
}

</mosaic_0001>

<bundles_post_ra>
// kernel: tpu_custom_call.1
= control target key start
LH: loop header
LB: loop body
LE: loop exit
PB: predicated region body
PF: predicated region fallthrough
CT: control target
= control target key end

     0   :  { %s594_s0 = inlined_call_operand.<no memory space> [shape: f32[1], index: 0, kind: input, shape index: {}]   ;;  %s595_s1 = inlined_call_operand.hbm [shape: f32[16,128], index: 1, kind: input, shape index: {}]   ;;  %s596_s2 = inlined_call_operand.hbm [shape: f32[16,128], index: 2, kind: output, shape index: {}]  }
   0x1   :  { %7 = sst [smem:[#allocation2]] %s594_s0 }
   0x2   :  { %8 = vsyncpa [#allocation4], 0 }
   0x3   :  { %10 = vsyncpa [#allocation4 + $0x1], 0 }
   0x4   :  { %11 = vsyncpa [#allocation5], 0 }
   0x5   :  { %13 = vsyncpa [#allocation5 + $0x1], 0  ;;  %s433_s11 = smov 0   ;;  %s435_s12 = smov 0  }
   0x6   :  { %s437_s13 = smov 0   ;;  %s439_s14 = smov 0  }
   0x7 LB: > { %s454_s0 = sadd.s32 4294967295, %s411_s14   ;;  %s255_s15 = sadd.s32 4294967294, %s411_s14   ;;  %s411_s14 = sphi %s439_s14, %s611_s14   ;;  %s407_s13 = sphi %s437_s13, %s610_s13   ;;  %s403_s12 = sphi %s435_s12, %s609_s12   ;;  %s399_s11 = sphi %s433_s11, %s608_s11  }
   0x8   : > { %s458_s16 = sadd.s32 1, %s411_s14   ;;  %s47_s17 = sadd.s32 1, %s407_s13 }
   0x9   : > { %s44_s18 = ssub.s32 %s411_s14, %s458_s16  ;;  %p54_p0 = scmp.ne.s32.totalorder %s407_s13, %s403_s12 }
   0xa   : > { %p45_p1 = scmp.eq.s32.totalorder %s44_s18, 0  ;;  %p55_p2 = scmp.eq.s32.totalorder %s411_s14, 0 }
   0xb   : > { %p60_p3 = scmp.ne.s32.totalorder %s403_s12, %s399_s11  ;;  %p61_p4 = scmp.eq.s32.totalorder %s454_s0, 0 }
   0xc   : > { %s470_s19 = scalar_select %p45_p1, %s407_s13, %s47_s17  }
   0xd   : > { %p472_p5 = por %p55_p2, %p54_p0  ;;  %p476_p6 = por %p61_p4, %p60_p3 }
   0xe   : > { %p84_p7 = scmp.eq.s32.totalorder %s454_s0, 1  ;;  %p90_p8 = scmp.eq.s32.totalorder %s255_s15, 1 }
   0xf   : > { %p279_p10 = scmp.lt.s32.totalorder %s411_s14, 2  ;;  %s113_s24 = sand.u32 1, %s407_s13  }
  0x10   : > { %p483_p11 = por %p84_p7, %p54_p0  ;;  %p487_p12 = por %p90_p8, %p60_p3 }
  0x11   : > { %s259_s25 = sshll.u32 %s411_s14, 7  ;;  %s258_s26 = sshll.u32 %s113_s24, 3 }
  0x12   : > { %s600_s22 = scalar_select %p483_p11, 1, 0 }
  0x13   : > { %s601_s23 = scalar_select %p487_p12, 1, 0 }
  0x14   : > { %s496_s29 = scalar_lea.hbm %s595_s1, %s259_s25  ;;  %s117_s30 = scalar_lea.vmem [#allocation3], %s258_s26 }
  0x15   : > { %s124_s3 = sshll.u32 %s117_s30, 4  ;;  %p500_p13 = pnand %p279_p10, %p472_p5  ;;  %s504_s3 = int_to_ptr.vmem [resolvable:$true] %s124_s3 }
  0x16   : > { %s114_s5 = scalar_lea.sflag [#allocation4], %s113_s24  ;;  %s315_s6 = scalar_lea.hbm %s496_s29, 128 }
  0x17   : > { %p316_p2 = scmp.ne.s32.totalorder %s496_s29, %s315_s6  ;;  %p317_p3 = pneg %p500_p13 }
  0x18   : > { %s320_s9 = scalar_lea.hbm %s595_s1, 256  ;;  %p321_p5 = scmp.lt.u32.totalorder %s496_s29, %s595_s1 }
  0x19   : > { %p318_p4 = pnand %p317_p3, %p316_p2  ;;  %p322_p8 = scmp.lt.u32.totalorder %s320_s9, %s315_s6 }
  0x1a   : > { %p324_p9 = scmp.lt.u32.totalorder %s315_s6, %s496_s29 }
  0x1b   : > { %p319_p7 = pneg %p318_p4  ;;  %p323_p10 = por %p322_p8, %p321_p5 }
  0x1d   : > { %p325_p0 = por %p324_p9, %p323_p10 }
  0x1f   : > { %p326_p1 = pnand %p325_p0, %p319_p7 }
  0x21   : > { %329 = shalt.err (!%p326_p1)
}
  0x22   : > { %s330_s17 = scalar_lea.vmem %s504_s3, 128  ;;  %s413_s18 = smov [#allocation3]  }
  0x23   : > { %p331_p2 = scmp.ne.s32.totalorder %s504_s3, %s330_s17  ;;  %s335_s20 = sshll.u32 %s413_s18, 4  ;;  %s336_s20 = int_to_ptr.vmem [resolvable:$false] %s335_s20 }
  0x24   : > { %s337_s24 = scalar_lea.vmem %s336_s20, 256  ;;  %p338_p11 = scmp.lt.s32.totalorder %s504_s3, %s336_s20 }
  0x25   : > { %p333_p4 = pnand %p331_p2, %p317_p3  ;;  %p339_p5 = scmp.lt.s32.totalorder %s337_s24, %s330_s17 }
  0x27   : > { %p334_p12 = pneg %p333_p4  ;;  %p340_p8 = por %p339_p5, %p338_p11 }
  0x29   : > { %p341_p9 = pnand %p340_p8, %p334_p12 }
  0x2b   : > { %344 = shalt.err (!%p341_p9)
}
  0x2c   : > { %274 = dma.hbm_to_vmem [thread:$0]  (!%p500_p13), %s496_s29, 128, %s504_s3, %s114_s5  }
  0x2d   : > { %p603_p0 = scmp.lt.s32.totalorder %s411_s14, 3  ;;  %p604_p1 = scmp.ge.s32.totalorder %s411_s14, 1 }
  0x2f   : > { %p130_p3 = pnand %p604_p1, %p603_p0 }
  0x30   : > { %s538_s25 = sand.u32 (!%p130_p3), 1, %s403_s12  }
  0x31   : > { %133 = sbr.rel (%p130_p3) target bundleno = 233 (0xe9), region = 28  ;;  %s261_s26 = sshll.u32 (!%p130_p3), %s538_s25, 3 }
  0x32   : > { %s136_s27 = scalar_lea.sflag (!%p130_p3), [#allocation4], %s538_s25  ;;  %s139_s28 = scalar_lea.vmem (!%p130_p3), [#allocation3], %s261_s26 }
  0x38   : > { %390 = dma.done.wait (%p476_p6), %s136_s27, 128  }
  0x39   : > { %392 = vsyncadd (%p476_p6), %s136_s27, 4294967168  ;;  %v160_v0 = vld [vmem:[%s139_s28] sm:$0xff]  ;;  %s166_s29 = sld [smem:[#allocation2]]  ;;  %s264_s30 = sshll.u32 %s454_s0, 7 }
  0x3a   : > { %v161_v1 = vmul.f32 %v160_v0, %v160_v0  ;;  %s159_s3 = scalar_lea.vmem [#allocation6], %s261_s26  ;;  %s550_s6 = scalar_lea.hbm %s596_s2, %s264_s30 }
  0x3b   : > { %s185_s4 = sshll.u32 %s159_s3, 4  ;;  %s172_s7 = scalar_lea.sflag [#allocation5], %s538_s25  ;;  %s552_s4 = int_to_ptr.vmem [resolvable:$true] %s185_s4 }
  0x3c   : > { %162 = vadd.xlane.f32.xlu0 %v161_v1  ;;  %s345_s8 = scalar_lea.vmem %s552_s4, 128  ;;  %p605_p11 = scmp.ne.s32.totalorder %s600_s22, 0 }
  0x3d   : > { %p346_p6 = scmp.ne.s32.totalorder %s552_s4, %s345_s8  ;;  %s414_s0 = smov [#allocation6]  }
  0x3e   : > { %s349_s9 = sshll.u32 %s414_s0, 4  ;;  %s350_s9 = int_to_ptr.vmem [resolvable:$false] %s349_s9 }
  0x3f   : > { %v167_v4 = vstv %s166_s29  ;;  %p347_p12 = pnand %p346_p6, %p605_p11  ;;  %s351_s10 = scalar_lea.vmem %s350_s9, 256 }
  0x40   : > { %p352_p7 = scmp.lt.s32.totalorder %s552_s4, %s350_s9  ;;  %p353_p10 = scmp.lt.s32.totalorder %s351_s10, %s345_s8 }
  0x41   : > { %p348_p13 = pneg %p347_p12 }
  0x42   : > { %p354_p2 = por %p353_p10, %p352_p7 }
  0x44   : > { %p355_p4 = pnand %p354_p2, %p348_p13 }
  0xc9   : > { %v163_v2 = vpop.xlane.xlu0 %162 }
  0xca   : > { %v164_v3 = vmax.f32 %v163_v2, 1e-10 }
  0xcc   : > { %313 = vrsqrt.f32 %v164_v3 }
  0xd6   : > { %v314_v5 = vpop.eup %313 }
  0xd7   : > { %v168_v6 = vmul.f32 %v314_v5, %v167_v4 }
  0xd9   : > { %v169_v7 = vmul.f32 %v168_v6, %v160_v0 }
  0xdb   : > { %170 = vst [vmem:[%s159_s3] sm:$0xff] %v169_v7 }
  0xdc   : > { %358 = shalt.err (!%p355_p4)
}
  0xdd   : > { %s359_s15 = scalar_lea.hbm %s550_s6, 128  ;;  %s363_s20 = scalar_lea.hbm %s596_s2, 256 }
  0xde   : > { %p360_p5 = scmp.ne.s32.totalorder %s550_s6, %s359_s15  ;;  %p364_p0 = scmp.lt.u32.totalorder %s550_s6, %s596_s2 }
  0xdf   : > { %p365_p1 = scmp.lt.u32.totalorder %s363_s20, %s359_s15  ;;  %p367_p6 = scmp.lt.u32.totalorder %s359_s15, %s550_s6 }
  0xe0   : > { %p361_p8 = pnand %p360_p5, %p605_p11 }
  0xe1   : > { %p366_p3 = por %p365_p1, %p364_p0 }
  0xe2   : > { %p362_p9 = pneg %p361_p8 }
  0xe3   : > { %p368_p12 = por %p367_p6, %p366_p3 }
  0xe5   : > { %p369_p13 = pnand %p368_p12, %p362_p9 }
  0xe7   : > { %372 = shalt.err (!%p369_p13)
}
  0xe8   : > { %269 = dma.vmem_to_hbm [thread:$0]  (%p605_p11), %s552_s4, 128, %s550_s6, %s172_s7  }
  0xe9 PF: > { %s197_s26 = sand.u32 1, %s399_s11   ;;  %p606_p7 = scmp.ne.s32.totalorder %s601_s23, 0 }
  0xea   : > { %p607_p10 = scmp.ge.s32.totalorder %s411_s14, 2  ;;  %s198_s27 = scalar_lea.sflag [#allocation5], %s197_s26 }
  0xec   : > { %p276_p2 = pnand %p607_p10, %p606_p7 }
  0xee   : > { %394 = dma.done.wait (!%p276_p2), %s198_s27, 128  }
  0xef   : > { %396 = vsyncadd (!%p276_p2), %s198_s27, 4294967168  ;;  %p16_p4 = scmp.ge.s32.totalorder %s458_s16, 4   ;;  %s608_s11 = smov %s403_s12 }
  0xf0   : > { %s609_s12 = smov %s407_s13  ;;  %s610_s13 = smov %s470_s19 }
  0xf1   : > { %s611_s14 = smov %s458_s16  ;;  %18 = sbr.rel (!%p16_p4) target bundleno = 7 (0x7), region = 73 }
  0xf8   :  { %203 = vsyncpa [#allocation4], 1 }
  0xf9   :  { %205 = vsyncpa [#allocation4 + $0x1], 1 }
  0xfa   :  { %206 = vsyncpa [#allocation5], 1 }
  0xfb   :  { %208 = vsyncpa [#allocation5 + $0x1], 1 }

</bundles_post_ra>
